<compile_context>
chip_gen: v7x
topology: tpu7x:2x2x1
jax: 0.10.0
libtpu: 0.0.40
codegen_flags: <defaults>
</compile_context>

<pallas_src>
import functools

import jax
import jax.numpy as jnp
from jax import lax
from jax.experimental import pallas as pl
from jax.experimental.pallas import tpu as pltpu

LN_EPS = 1e-5  # torch.nn.LayerNorm default


def _round_up(x, m):
    return ((x + m - 1) // m) * m


def _tpu_tuning():
    """Generation-gated knobs: VMEM scoped limit, chunk budget, 2-TC split."""
    try:
        kind = jax.devices()[0].device_kind.lower()
    except Exception:  # pragma: no cover - no device visible at trace time
        kind = ""
    if ("v5" in kind) or ("v6" in kind):
        # 128 MiB physical VMEM, single TensorCore: big chunks, generous limit.
        return dict(two_tc=False, vmem_limit=96 * 2**20,
                    budget=64 * 2**20, tt_target=128)
    # v7x (64 MiB physical VMEM, 2 TensorCores) and unknown parts: conservative.
    return dict(two_tc=("v7" in kind), vmem_limit=48 * 2**20,
                budget=32 * 2**20, tt_target=64)


def _choose_time_chunk(T, Bp, hp, budget, target):
    """Largest multiple-of-8 chunk <= target whose pipelined footprint fits."""
    g3 = 3 * hp

    def footprint(tt):
        return (2 * tt * Bp * g3 * 2      # gi blocks (bf16), double-buffered
                + 2 * tt * Bp * hp * 4    # seq blocks (f32), double-buffered
                + 2 * hp * g3 * 2         # W_hh (bf16), double-buffered
                + Bp * hp * 4)            # h scratch

    tt = min(_round_up(T, 8), _round_up(target, 8))
    while tt > 8 and footprint(tt) > budget:
        tt -= 8
    return tt


# ----------------------------------------------------------------------------
# Kernel 1: layer-0 input projection fused with the input LayerNorm.
#   x_ref:  (tt, Bp, D_in)  time-major raw-input slab
#   gi_ref: (tt, Bp, 3*Hp)  bf16 gate pre-activations (r | z | n blocks)
# One batched MXU matmul per chunk (M = tt*Bp), weight held resident.
# ----------------------------------------------------------------------------
def _proj0_kernel(x_ref, g_ref, b_ref, w_ref, bias_ref, gi_ref):
    x = x_ref[...]                                   # (tt, Bp, D_in) f32
    mu = jnp.mean(x, axis=-1, keepdims=True)
    var = jnp.mean((x - mu) ** 2, axis=-1, keepdims=True)
    xn = (x - mu) * lax.rsqrt(var + LN_EPS) * g_ref[...] + b_ref[...]
    tt, bp, d = xn.shape
    flat = xn.reshape(tt * bp, d).astype(jnp.bfloat16)   # leading-axis collapse
    gi = jnp.dot(flat, w_ref[...],
                 preferred_element_type=jnp.float32) + bias_ref[...]
    gi_ref[...] = gi.reshape(tt, bp, -1).astype(gi_ref.dtype)


# ----------------------------------------------------------------------------
# Kernel 2: input projection for layers >= 1 (previous layer's sequence).
#   h_ref: (tt, Bp, Hp)   gi_ref: (tt, Bp, 3*Hp) bf16
# ----------------------------------------------------------------------------
def _proj_kernel(h_ref, w_ref, bias_ref, gi_ref):
    tt, bp, hp = h_ref.shape
    flat = h_ref[...].reshape(tt * bp, hp).astype(jnp.bfloat16)
    gi = jnp.dot(flat, w_ref[...],
                 preferred_element_type=jnp.float32) + bias_ref[...]
    gi_ref[...] = gi.reshape(tt, bp, -1).astype(gi_ref.dtype)


# ----------------------------------------------------------------------------
# Shared recurrence over one time chunk.  Per step: one [Bt,Hp]x[Hp,3Hp] MXU
# matmul + gates.  Gate slices are lane-aligned (Hp multiple of 128).
# Padded timesteps (t >= t_valid) keep h unchanged so 'last' pooling is exact.
# ----------------------------------------------------------------------------
def _gru_chunk(gi_ref, whh, bhn, h0, seq_ref, t_base, t_valid):
    hp = whh.shape[0]
    tt = gi_ref.shape[0]

    def body(i, h):
        gi = gi_ref[i].astype(jnp.float32)           # (bt, 3Hp), bf16 -> f32
        gh = jnp.dot(h.astype(jnp.bfloat16), whh,
                     preferred_element_type=jnp.float32)
        r = jax.nn.sigmoid(gi[:, :hp] + gh[:, :hp])
        z = jax.nn.sigmoid(gi[:, hp:2 * hp] + gh[:, hp:2 * hp])
        n = jnp.tanh(gi[:, 2 * hp:] + r * (gh[:, 2 * hp:] + bhn))
        h_new = (1.0 - z) * n + z * h
        if t_valid is not None:                      # static: only when T padded
            keep = (t_base + i < t_valid).astype(jnp.float32)
            h_new = keep * h_new + (1.0 - keep) * h
        if seq_ref is not None:
            seq_ref[i] = h_new                       # lane-dense (bt, Hp) store
        return h_new

    return lax.fori_loop(0, tt, body, h0, unroll=2)


# ----------------------------------------------------------------------------
# Kernel 3: GRU layer that emits its full hidden sequence (layers < last).
# grid = (batch_tiles, time_chunks); h carried across chunks in VMEM scratch.
# ----------------------------------------------------------------------------
def _gru_seq_kernel(gi_ref, whh_ref, bhn_ref, seq_ref, h_ref, *, t_valid):
    @pl.when(pl.program_id(1) == 0)
    def _init():
        h_ref[...] = jnp.zeros_like(h_ref)

    t_base = pl.program_id(1) * gi_ref.shape[0]
    h_ref[...] = _gru_chunk(gi_ref, whh_ref[...], bhn_ref[...], h_ref[...],
                            seq_ref, t_base, t_valid)


# ----------------------------------------------------------------------------
# Kernel 4: last GRU layer fused with the head (pooling_type == 'last').
# Never writes the [T,B,H] sequence; only [Bt, output_dim] on the last chunk.
#   head: LayerNorm(H) -> Linear(H,2H) -> ReLU -> LayerNorm(2H) -> Linear(2H,O)
#   (dropouts are inference-mode identities)
# ----------------------------------------------------------------------------
def _gru_last_kernel(gi_ref, whh_ref, bhn_ref,
                     pg_g_ref, pg_b_ref, w1_ref, c1_ref,
                     lng_ref, lnb_ref, w2_ref, c2_ref,
                     out_ref, h_ref, *, h_valid, t_valid):
    @pl.when(pl.program_id(1) == 0)
    def _init():
        h_ref[...] = jnp.zeros_like(h_ref)

    t_base = pl.program_id(1) * gi_ref.shape[0]
    h = _gru_chunk(gi_ref, whh_ref[...], bhn_ref[...], h_ref[...],
                   None, t_base, t_valid)
    h_ref[...] = h

    @pl.when(pl.program_id(1) == pl.num_programs(1) - 1)
    def _head():
        hp = h.shape[-1]
        # post_gru_norm: masked LayerNorm over the first h_valid (real) lanes
        lane = lax.broadcasted_iota(jnp.int32, (1, hp), 1)
        mask = (lane < h_valid).astype(jnp.float32)
        mu = jnp.sum(h * mask, axis=-1, keepdims=True) / float(h_valid)
        d = (h - mu) * mask
        var = jnp.sum(d * d, axis=-1, keepdims=True) / float(h_valid)
        y = d * lax.rsqrt(var + LN_EPS) * pg_g_ref[...] + pg_b_ref[...]
        # post_gru_dropout + fc Dropout: identity in eval mode
        z1 = jnp.dot(y, w1_ref[...], preferred_element_type=jnp.float32) + c1_ref[...]
        z1 = jnp.maximum(z1, 0.0)
        mu2 = jnp.mean(z1, axis=-1, keepdims=True)
        var2 = jnp.mean((z1 - mu2) ** 2, axis=-1, keepdims=True)
        z2 = (z1 - mu2) * lax.rsqrt(var2 + LN_EPS) * lng_ref[...] + lnb_ref[...]
        out_ref[...] = jnp.dot(z2, w2_ref[...],
                               preferred_element_type=jnp.float32) + c2_ref[...]


# ----------------------------------------------------------------------------
# Full forward pass.
# ----------------------------------------------------------------------------
def gru_backbone_forward(x, kp, hidden_dim):
    B, T, D_in = x.shape
    gru = kp["gru"]
    num_layers = len(gru)
    hp = gru[0]["whh"].shape[0]          # padded hidden (multiple of 128)
    g3 = 3 * hp
    f1 = kp["fc1_w"].shape[1]
    d_out = kp["fc2_w"].shape[1]

    tune = _tpu_tuning()

    # Batch padding to fill sublanes (and enable the v7x 2-TC split).
    Bp = _round_up(B, 8)
    n_b = 2 if (tune["two_tc"] and Bp % 32 == 0) else 1   # bf16-tile aligned tiles
    bt = Bp // n_b

    # Time chunking with a per-generation VMEM-feasibility check; T is padded
    # to a multiple of tt and the padded steps are masked in the recurrence.
    tt = _choose_time_chunk(T, Bp, hp, tune["budget"], tune["tt_target"])
    Tp = _round_up(T, tt)
    n_t = Tp // tt
    t_valid = T if Tp != T else None

    if (Bp, Tp) != (B, T):
        x = jnp.pad(x, ((0, Bp - B), (0, Tp - T), (0, 0)))
    # One tiny XLA transpose of the raw input (T*B*D_in) to time-major; gi and
    # seq are produced time-major directly, so no big transposes anywhere.
    x_tm = jnp.transpose(x, (1, 0, 2))                    # (Tp, Bp, D_in)

    vmem = tune["vmem_limit"]
    proj_cp = pltpu.CompilerParams(dimension_semantics=("parallel",),
                                   vmem_limit_bytes=vmem)
    rec_cp = pltpu.CompilerParams(dimension_semantics=("parallel", "arbitrary"),
                                  vmem_limit_bytes=vmem)

    # --- layer 0: fused input LayerNorm + batched input projection ---
    gi = pl.pallas_call(
        _proj0_kernel,
        out_shape=jax.ShapeDtypeStruct((Tp, Bp, g3), jnp.bfloat16),
        grid=(n_t,),
        in_specs=[
            pl.BlockSpec((tt, Bp, D_in), lambda t: (t, 0, 0)),
            pl.BlockSpec((1, 1, D_in), lambda t: (0, 0, 0)),
            pl.BlockSpec((1, 1, D_in), lambda t: (0, 0, 0)),
            pl.BlockSpec((D_in, g3), lambda t: (0, 0)),
            pl.BlockSpec((1, g3), lambda t: (0, 0)),
        ],
        out_specs=pl.BlockSpec((tt, Bp, g3), lambda t: (t, 0, 0)),
        compiler_params=proj_cp,
    )(x_tm, kp["in_g"], kp["in_b"], gru[0]["wih"], gru[0]["bih"])

    seq = None
    out = None
    for li in range(num_layers):
        if li > 0:
            # hoisted, batched input projection for layer li (inter-layer
            # dropout = identity in eval mode).
            gi = pl.pallas_call(
                _proj_kernel,
                out_shape=jax.ShapeDtypeStruct((Tp, Bp, g3), jnp.bfloat16),
                grid=(n_t,),
                in_specs=[
                    pl.BlockSpec((tt, Bp, hp), lambda t: (t, 0, 0)),
                    pl.BlockSpec((hp, g3), lambda t: (0, 0)),
                    pl.BlockSpec((1, g3), lambda t: (0, 0)),
                ],
                out_specs=pl.BlockSpec((tt, Bp, g3), lambda t: (t, 0, 0)),
                compiler_params=proj_cp,
            )(seq, gru[li]["wih"], gru[li]["bih"])

        if li < num_layers - 1:
            seq = pl.pallas_call(
                functools.partial(_gru_seq_kernel, t_valid=t_valid),
                out_shape=jax.ShapeDtypeStruct((Tp, Bp, hp), jnp.float32),
                grid=(n_b, n_t),
                in_specs=[
                    pl.BlockSpec((tt, bt, g3), lambda b, t: (t, b, 0)),
                    pl.BlockSpec((hp, g3), lambda b, t: (0, 0)),
                    pl.BlockSpec((1, hp), lambda b, t: (0, 0)),
                ],
                out_specs=pl.BlockSpec((tt, bt, hp), lambda b, t: (t, b, 0)),
                scratch_shapes=[pltpu.VMEM((bt, hp), jnp.float32)],
                compiler_params=rec_cp,
            )(gi, gru[li]["whh"], gru[li]["bhn"])
        else:
            # last layer: no sequence writeback; head fused on the final h.
            out = pl.pallas_call(
                functools.partial(_gru_last_kernel,
                                  h_valid=hidden_dim, t_valid=t_valid),
                out_shape=jax.ShapeDtypeStruct((Bp, d_out), jnp.float32),
                grid=(n_b, n_t),
                in_specs=[
                    pl.BlockSpec((tt, bt, g3), lambda b, t: (t, b, 0)),
                    pl.BlockSpec((hp, g3), lambda b, t: (0, 0)),
                    pl.BlockSpec((1, hp), lambda b, t: (0, 0)),
                    pl.BlockSpec((1, hp), lambda b, t: (0, 0)),
                    pl.BlockSpec((1, hp), lambda b, t: (0, 0)),
                    pl.BlockSpec((hp, f1), lambda b, t: (0, 0)),
                    pl.BlockSpec((1, f1), lambda b, t: (0, 0)),
                    pl.BlockSpec((1, f1), lambda b, t: (0, 0)),
                    pl.BlockSpec((1, f1), lambda b, t: (0, 0)),
                    pl.BlockSpec((f1, d_out), lambda b, t: (0, 0)),
                    pl.BlockSpec((1, d_out), lambda b, t: (0, 0)),
                ],
                out_specs=pl.BlockSpec((bt, d_out), lambda b, t: (b, 0)),
                scratch_shapes=[pltpu.VMEM((bt, hp), jnp.float32)],
                compiler_params=rec_cp,
            )(gi, gru[li]["whh"], gru[li]["bhn"],
              kp["pg_g"], kp["pg_b"], kp["fc1_w"], kp["fc1_b"],
              kp["fc_ln_g"], kp["fc_ln_b"], kp["fc2_w"], kp["fc2_b"])
    return out[:B]


# ----------------------------------------------------------------------------
# Deterministic synthetic parameters at the module's logical shapes.
# ----------------------------------------------------------------------------
def init_params(key, input_dim, hidden_dim, num_layers, output_dim):
    keys = iter(jax.random.split(key, 64))

    def normal(shape, std):
        return std * jax.random.normal(next(keys), shape, jnp.float32)

    params = {
        "in_g": jnp.ones((input_dim,), jnp.float32),
        "in_b": jnp.zeros((input_dim,), jnp.float32),
        "pg_g": jnp.ones((hidden_dim,), jnp.float32),
        "pg_b": jnp.zeros((hidden_dim,), jnp.float32),
        "fc_ln_g": jnp.ones((2 * hidden_dim,), jnp.float32),
        "fc_ln_b": jnp.zeros((2 * hidden_dim,), jnp.float32),
        "gru": [],
    }
    d_in = input_dim
    for _ in range(num_layers):
        # stored pre-transposed: [in, 3H]; gate order r, z, n (PyTorch)
        params["gru"].append({
            "wih": normal((d_in, 3 * hidden_dim), 1.0 / jnp.sqrt(d_in)),
            "whh": normal((hidden_dim, 3 * hidden_dim), 1.0 / jnp.sqrt(hidden_dim)),
            "bih": normal((3 * hidden_dim,), 1.0 / jnp.sqrt(hidden_dim)),
            "bhh": normal((3 * hidden_dim,), 1.0 / jnp.sqrt(hidden_dim)),
        })
        d_in = hidden_dim

    params["fc1_w"] = normal((hidden_dim, 2 * hidden_dim),
                             jnp.sqrt(2.0 / (hidden_dim + 2 * hidden_dim)))
    params["fc1_b"] = jnp.full((2 * hidden_dim,), 0.1, jnp.float32)
    params["fc2_w"] = normal((2 * hidden_dim, output_dim),
                             jnp.sqrt(2.0 / (2 * hidden_dim + output_dim)))
    params["fc2_b"] = jnp.full((output_dim,), 0.1, jnp.float32)
    return params


# ----------------------------------------------------------------------------
# Pack parameters for the kernels: pad hidden to a multiple of 128 lanes
# (per-gate zero padding, so r/z/n slices are lane-aligned and padded hidden
# lanes stay exactly zero through the recurrence), cast matmul weights to
# bf16, and fold the r/z parts of b_hh into b_ih (only b_hn stays inside the
# recurrence).
# ----------------------------------------------------------------------------
def pack_params(params, hidden_dim):
    hp = _round_up(hidden_dim, 128)
    pad_h = hp - hidden_dim

    def pad_gate_cols(w):  # [..., 3H] -> [..., 3Hp], per-gate zero pad
        parts = jnp.split(w, 3, axis=-1)
        parts = [jnp.pad(p, [(0, 0)] * (p.ndim - 1) + [(0, pad_h)]) for p in parts]
        return jnp.concatenate(parts, axis=-1)

    def pad_rows(w, rows_to):
        return jnp.pad(w, [(0, rows_to - w.shape[0]), (0, 0)])

    packed = {
        "in_g": params["in_g"].reshape(1, 1, -1),
        "in_b": params["in_b"].reshape(1, 1, -1),
        "pg_g": jnp.pad(params["pg_g"], (0, pad_h)).reshape(1, -1),
        "pg_b": jnp.pad(params["pg_b"], (0, pad_h)).reshape(1, -1),
        "fc1_w": pad_rows(params["fc1_w"], hp),            # [Hp, 2H]
        "fc1_b": params["fc1_b"].reshape(1, -1),
        "fc_ln_g": params["fc_ln_g"].reshape(1, -1),
        "fc_ln_b": params["fc_ln_b"].reshape(1, -1),
        "fc2_w": params["fc2_w"],                          # [2H, D_out]
        "fc2_b": params["fc2_b"].reshape(1, -1),
        "gru": [],
    }
    h = hidden_dim
    for li, lp in enumerate(params["gru"]):
        wih = pad_gate_cols(lp["wih"])                     # [d_in, 3Hp]
        if li > 0:
            wih = pad_rows(wih, hp)                        # prev hidden is Hp wide
        whh = pad_rows(pad_gate_cols(lp["whh"]), hp)       # [Hp, 3Hp]
        bih_eff = lp["bih"].at[: 2 * h].add(lp["bhh"][: 2 * h])
        bhn = jnp.pad(lp["bhh"][2 * h:], (0, pad_h)).reshape(1, -1)
        packed["gru"].append({
            "wih": wih.astype(jnp.bfloat16),               # bf16 MXU, f32 accum
            "whh": whh.astype(jnp.bfloat16),
            "bih": pad_gate_cols(bih_eff.reshape(1, -1)),  # f32, added in proj
            "bhn": bhn,                                    # f32, n-gate only
        })
    return packed


if __name__ == "__main__":
    B, T, D_IN, HIDDEN, N_LAYERS, D_OUT = 2, 8, 4, 32, 2, 64

    key = jax.random.PRNGKey(0)
    k_param, k_x = jax.random.split(key)
    params = init_params(k_param, D_IN, HIDDEN, N_LAYERS, D_OUT)
    packed = pack_params(params, HIDDEN)
    x = jax.random.normal(k_x, (B, T, D_IN), jnp.float32)

    out = gru_backbone_forward(x, packed, HIDDEN)
    out = jax.block_until_ready(out)

    assert out.shape == (B, D_OUT), out.shape
    assert bool(jnp.all(jnp.isfinite(out)))
    print("KERNEL_OK")
</pallas_src>

<mosaic_0001>
module attributes {stable_mosaic.version = 11 : i64} {
  func.func @_proj0_kernel(%arg0: i32, %arg1: memref<8x8x4xf32, #tpu.memory_space<vmem>>, %arg2: memref<1x1x4xf32, #tpu.memory_space<vmem>>, %arg3: memref<1x1x4xf32, #tpu.memory_space<vmem>>, %arg4: memref<4x384xbf16, #tpu.memory_space<vmem>>, %arg5: memref<1x384xf32, #tpu.memory_space<vmem>>, %arg6: memref<8x8x384xbf16, #tpu.memory_space<vmem>>) attributes {dimension_semantics = [#tpu.dimension_semantics<parallel>], iteration_bounds = array<i64: 1>, scalar_prefetch = 0 : i64, scratch_operands = 0 : i64, tpu.core_type = #tpu.core_type<tc>, window_params = [{transform_indices = @transform_0, window_bounds = array<i64: 8, 8, 4>}, {pipeline_mode = #tpu.pipeline_mode<synchronous>, transform_indices = @transform_1, window_bounds = array<i64: 1, 1, 4>}, {pipeline_mode = #tpu.pipeline_mode<synchronous>, transform_indices = @transform_2, window_bounds = array<i64: 1, 1, 4>}, {pipeline_mode = #tpu.pipeline_mode<synchronous>, transform_indices = @transform_3, window_bounds = array<i64: 4, 384>}, {pipeline_mode = #tpu.pipeline_mode<synchronous>, transform_indices = @transform_4, window_bounds = array<i64: 1, 384>}, {transform_indices = @transform_5, window_bounds = array<i64: 8, 8, 384>}]} {
    %c0 = arith.constant 0 : index
    %c0_0 = arith.constant 0 : index
    %c0_1 = arith.constant 0 : index
    %0 = vector.load %arg1[%c0, %c0_0, %c0_1] : memref<8x8x4xf32, #tpu.memory_space<vmem>>, vector<8x8x4xf32>
    %cst = arith.constant dense<0.000000e+00> : vector<8x8xf32>
    %1 = vector.multi_reduction <add>, %0, %cst [2] : vector<8x8x4xf32> to vector<8x8xf32>
    %2 = vector.shape_cast %1 : vector<8x8xf32> to vector<8x8x1xf32>
    %cst_2 = arith.constant 4.000000e+00 : f32
    %3 = vector.broadcast %cst_2 : f32 to vector<8x8x1xf32>
    %4 = arith.divf %2, %3 : vector<8x8x1xf32>
    %5 = vector.broadcast %4 : vector<8x8x1xf32> to vector<8x8x4xf32>
    %6 = arith.subf %0, %5 : vector<8x8x4xf32>
    %7 = arith.mulf %6, %6 : vector<8x8x4xf32>
    %cst_3 = arith.constant dense<0.000000e+00> : vector<8x8xf32>
    %8 = vector.multi_reduction <add>, %7, %cst_3 [2] : vector<8x8x4xf32> to vector<8x8xf32>
    %9 = vector.shape_cast %8 : vector<8x8xf32> to vector<8x8x1xf32>
    %cst_4 = arith.constant 4.000000e+00 : f32
    %10 = vector.broadcast %cst_4 : f32 to vector<8x8x1xf32>
    %11 = arith.divf %9, %10 : vector<8x8x1xf32>
    %12 = vector.broadcast %4 : vector<8x8x1xf32> to vector<8x8x4xf32>
    %13 = arith.subf %0, %12 : vector<8x8x4xf32>
    %cst_5 = arith.constant 9.99999974E-6 : f32
    %14 = vector.broadcast %cst_5 : f32 to vector<8x8x1xf32>
    %15 = arith.addf %11, %14 : vector<8x8x1xf32>
    %16 = math.rsqrt %15 : vector<8x8x1xf32>
    %17 = vector.broadcast %16 : vector<8x8x1xf32> to vector<8x8x4xf32>
    %18 = arith.mulf %13, %17 : vector<8x8x4xf32>
    %c0_6 = arith.constant 0 : index
    %c0_7 = arith.constant 0 : index
    %c0_8 = arith.constant 0 : index
    %19 = vector.load %arg2[%c0_6, %c0_7, %c0_8] : memref<1x1x4xf32, #tpu.memory_space<vmem>>, vector<1x1x4xf32>
    %20 = vector.broadcast %19 : vector<1x1x4xf32> to vector<8x8x4xf32>
    %21 = arith.mulf %18, %20 : vector<8x8x4xf32>
    %c0_9 = arith.constant 0 : index
    %c0_10 = arith.constant 0 : index
    %c0_11 = arith.constant 0 : index
    %22 = vector.load %arg3[%c0_9, %c0_10, %c0_11] : memref<1x1x4xf32, #tpu.memory_space<vmem>>, vector<1x1x4xf32>
    %23 = vector.broadcast %22 : vector<1x1x4xf32> to vector<8x8x4xf32>
    %24 = arith.addf %21, %23 : vector<8x8x4xf32>
    %25 = vector.shape_cast %24 : vector<8x8x4xf32> to vector<64x4xf32>
    %26 = arith.truncf %25 : vector<64x4xf32> to vector<64x4xbf16>
    %c0_12 = arith.constant 0 : index
    %c0_13 = arith.constant 0 : index
    %27 = vector.load %arg4[%c0_12, %c0_13] : memref<4x384xbf16, #tpu.memory_space<vmem>>, vector<4x384xbf16>
    %cst_14 = arith.constant dense<0.000000e+00> : vector<64x384xf32>
    %28 = tpu.matmul %26, %27, %cst_14 {dimension_numbers = #tpu.dot_dimension_numbers<[1], [0], [0], [1], [0, 0, 1, 1], [], []>} : vector<64x4xbf16>, vector<4x384xbf16>, vector<64x384xf32> -> vector<64x384xf32>
    %c0_15 = arith.constant 0 : index
    %c0_16 = arith.constant 0 : index
    %29 = vector.load %arg5[%c0_15, %c0_16] : memref<1x384xf32, #tpu.memory_space<vmem>>, vector<1x384xf32>
    %30 = vector.broadcast %29 : vector<1x384xf32> to vector<64x384xf32>
    %31 = arith.addf %28, %30 : vector<64x384xf32>
    %32 = vector.shape_cast %31 : vector<64x384xf32> to vector<8x8x384xf32>
    %33 = arith.truncf %32 : vector<8x8x384xf32> to vector<8x8x384xbf16>
    %c0_17 = arith.constant 0 : index
    %c0_18 = arith.constant 0 : index
    %c0_19 = arith.constant 0 : index
    %34 = vector.load %arg6[%c0_17, %c0_18, %c0_19] : memref<8x8x384xbf16, #tpu.memory_space<vmem>>, vector<8x8x384xbf16>
    tpu.vector_store %arg6[%c0_17, %c0_18, %c0_19], %33 {strides = array<i32>} : memref<8x8x384xbf16, #tpu.memory_space<vmem>>, vector<8x8x384xbf16>,
    return
  }
  func.func @transform_0(%arg0: i32) -> (i32, i32, i32) {
    %c0_i32 = arith.constant 0 : i32
    %c0_i32_0 = arith.constant 0 : i32
    %c0_i32_1 = arith.constant 0 : i32
    return %arg0, %c0_i32, %c0_i32_0 : i32, i32, i32
  }
  func.func @transform_1(%arg0: i32) -> (i32, i32, i32) {
    %c0_i32 = arith.constant 0 : i32
    %c0_i32_0 = arith.constant 0 : i32
    %c0_i32_1 = arith.constant 0 : i32
    %c0_i32_2 = arith.constant 0 : i32
    return %c0_i32, %c0_i32_0, %c0_i32_1 : i32, i32, i32
  }
  func.func @transform_2(%arg0: i32) -> (i32, i32, i32) {
    %c0_i32 = arith.constant 0 : i32
    %c0_i32_0 = arith.constant 0 : i32
    %c0_i32_1 = arith.constant 0 : i32
    %c0_i32_2 = arith.constant 0 : i32
    return %c0_i32, %c0_i32_0, %c0_i32_1 : i32, i32, i32
  }
  func.func @transform_3(%arg0: i32) -> (i32, i32) {
    %c0_i32 = arith.constant 0 : i32
    %c0_i32_0 = arith.constant 0 : i32
    %c0_i32_1 = arith.constant 0 : i32
    return %c0_i32, %c0_i32_0 : i32, i32
  }
  func.func @transform_4(%arg0: i32) -> (i32, i32) {
    %c0_i32 = arith.constant 0 : i32
    %c0_i32_0 = arith.constant 0 : i32
    %c0_i32_1 = arith.constant 0 : i32
    return %c0_i32, %c0_i32_0 : i32, i32
  }
  func.func @transform_5(%arg0: i32) -> (i32, i32, i32) {
    %c0_i32 = arith.constant 0 : i32
    %c0_i32_0 = arith.constant 0 : i32
    %c0_i32_1 = arith.constant 0 : i32
    return %arg0, %c0_i32, %c0_i32_0 : i32, i32, i32
  }
}

</mosaic_0001>

<bundles_post_ra>
// kernel: tpu_custom_call.1
= control target key start
LH: loop header
LB: loop body
LE: loop exit
PB: predicated region body
PF: predicated region fallthrough
CT: control target
= control target key end

     0   :  { %vm30_vm0 = vcmask 31744   ;;  %s778_s0 = inlined_call_operand.vmem [shape: f32[8,8,4], index: 0, kind: input, shape index: {}]   ;;  %s779_s1 = inlined_call_operand.vmem [shape: f32[1,1,4], index: 1, kind: input, shape index: {}]   ;;  %s780_s2 = inlined_call_operand.vmem [shape: f32[1,1,4], index: 2, kind: input, shape index: {}]   ;;  %s781_s3 = inlined_call_operand.vmem [shape: bf16[4,384], index: 3, kind: input, shape index: {}]   ;;  %s782_s4 = inlined_call_operand.vmem [shape: f32[1,384], index: 4, kind: input, shape index: {}]   ;;  %s783_s5 = inlined_call_operand.hbm [shape: bf16[8,8,384], index: 5, kind: output, shape index: {}]  }
   0x1   :  { %v22_v0 = vld [vmem:[%s778_s0] sm:$0xff]  ;;  %v28_v1 = vld [vmem:[%s778_s0 + $0x30] sm:$0xff]  ;;  %v23_v2 = vld [vmem:[%s778_s0 + $0x8] sm:$0xff] }
   0x2   :  { %v31_v3 = vsel %vm30_vm0, %v22_v0, 0.0  ;;  %v49_v4 = vsel %vm30_vm0, %v28_v1, 0.0  ;;  %v29_v5 = vld [vmem:[%s778_s0 + $0x38] sm:$0xff]  ;;  %v34_v6 = vsel %vm30_vm0, %v23_v2, 0.0 }
   0x3   :  { %32 = vadd.xlane.f32.xlu0 %v31_v3  ;;  %50 = vadd.xlane.f32.xlu1 %v49_v4  ;;  %v52_v7 = vsel %vm30_vm0, %v29_v5, 0.0 }
   0x4   :  { %10 = vsyncpa [#allocation3], 0  ;;  %v24_v8 = vld [vmem:[%s778_s0 + $0x10] sm:$0xff]  ;;  %v25_v9 = vld [vmem:[%s778_s0 + $0x18] sm:$0xff]  ;;  %v173_v56 = vlaneseq  ;;  %v608_v57 = vmov 1983009808  }
   0x5   :  { %v37_v10 = vsel %vm30_vm0, %v24_v8, 0.0  ;;  %v40_v11 = vsel %vm30_vm0, %v25_v9, 0.0  ;;  %v26_v12 = vld [vmem:[%s778_s0 + $0x20] sm:$0xff]  ;;  %v27_v13 = vld [vmem:[%s778_s0 + $0x28] sm:$0xff]  ;;  %v191_v58 = vunpack.c.l.s4 %v608_v57  ;;  %vm217_vm1 = vcmask 1041408  }
   0x6   :  { %v43_v14 = vsel %vm30_vm0, %v26_v12, 0.0  ;;  %v46_v15 = vsel %vm30_vm0, %v27_v13, 0.0  ;;  %v715_v59 = vshrl.u32 %v173_v56, 7  ;;  %v170_v62 = vld [vmem:[%s781_s3] sm:$0x3f] }
   0x7   :  { %35 = vadd.xlane.f32.xlu0 %v34_v6  ;;  %53 = vadd.xlane.f32.xlu1 %v52_v7  ;;  %v192_v60 = vunpack.c.0.s8 %v191_v58  ;;  %v189_v3 = vcombine.high %v170_v62, %v170_v62 }
   0x9   :  { %v195_v61 = vsub.s32 %v192_v60, %v715_v59 }
   0xb   :  { %38 = vadd.xlane.f32.xlu0 %v37_v10  ;;  %41 = vadd.xlane.f32.xlu1 %v40_v11  ;;  %v196_v63 = vrot.slane %v170_v62, %v195_v61  ;;  %v203_v4 = vrot.slane %v189_v3, %v195_v61 }
   0xf   :  { %44 = vadd.xlane.f32.xlu0 %v43_v14  ;;  %47 = vadd.xlane.f32.xlu1 %v46_v15 }
  0x90   :  { %v33_v16 = vpop.xlane.xlu0 %32  ;;  %v51_v17 = vpop.xlane.xlu1 %50 }
  0x91   :  { %v56_v18 = vmul.f32 0.25, %v33_v16  ;;  %v62_v19 = vmul.f32 0.25, %v51_v17 }
  0x93   :  { %v675_v20 = vsub.f32 %v22_v0, %v56_v18  ;;  %v677_v21 = vsub.f32 %v28_v1, %v62_v19  ;;  %v204_v0 = vcombine.high %v196_v63, %v196_v63  ;;  %v219_v1 = vsel %vm217_vm1, %v196_v63, 0 }
  0x94   :  { %v36_v22 = vpop.xlane.xlu0 %35  ;;  %v54_v23 = vpop.xlane.xlu1 %53 }
  0x95   :  { %v57_v24 = vmul.f32 0.25, %v36_v22  ;;  %v63_v25 = vmul.f32 0.25, %v54_v23  ;;  %v72_v26 = vmul.f32 %v675_v20, %v675_v20  ;;  %v78_v27 = vmul.f32 %v677_v21, %v677_v21  ;;  %503 = vmatprep.subr.msk.bf16.mxu0 %vm217_vm1, %v204_v0  ;;  %559 = vmatprep.subr.msk.bf16.mxu1 %vm217_vm1, %v204_v0 }
  0x96   :  { %228 = vmatpush1.bf16.msra.mxu0 %v219_v1  ;;  %560 = vmatpush1.bf16.msra.mxu1 %v219_v1 }
  0x97   :  { %v683_v28 = vsub.f32 %v23_v2, %v57_v24  ;;  %v685_v29 = vsub.f32 %v29_v5, %v63_v25  ;;  %v80_v30 = vsel %vm30_vm0, %v72_v26, 0.0  ;;  %v98_v33 = vsel %vm30_vm0, %v78_v27, 0.0  ;;  %561 = vmatprep.subr.msk.bf16.mxu1 %vm217_vm1, %v203_v4 }
  0x98   :  { %81 = vadd.xlane.f32.xlu0 %v80_v30  ;;  %v39_v31 = vpop.xlane.xlu0 %38  ;;  %v42_v32 = vpop.xlane.xlu1 %41  ;;  %v609_v2 = vmov 0   ;;  %v723_v5 = vsel %vm217_vm1, %v203_v4, 0 }
  0x99   :  { %v58_v34 = vmul.f32 0.25, %v39_v31  ;;  %v59_v35 = vmul.f32 0.25, %v42_v32  ;;  %v73_v36 = vmul.f32 %v683_v28, %v683_v28  ;;  %v79_v37 = vmul.f32 %v685_v29, %v685_v29  ;;  %259 = vmatprep.mubr.bf16.mxu0 %v609_v2  ;;  %289 = vmatprep.mubr.bf16.mxu1 %v609_v2 }
  0x9b   :  { %v693_v38 = vsub.f32 %v24_v8, %v58_v34  ;;  %v695_v39 = vsub.f32 %v25_v9, %v59_v35  ;;  %v83_v40 = vsel %vm30_vm0, %v73_v36, 0.0  ;;  %v101_v43 = vsel %vm30_vm0, %v79_v37, 0.0  ;;  %v501_v35 = vld [vmem:[%s779_s1] ss:$0 sm:$0xff] }
  0x9c   :  { %99 = vadd.xlane.f32.xlu0 %v98_v33  ;;  %84 = vadd.xlane.f32.xlu1 %v83_v40  ;;  %v45_v41 = vpop.xlane.xlu0 %44  ;;  %v48_v42 = vpop.xlane.xlu1 %47 }
  0x9d   :  { %v60_v44 = vmul.f32 0.25, %v45_v41  ;;  %v61_v45 = vmul.f32 0.25, %v48_v42  ;;  %v74_v46 = vmul.f32 %v693_v38, %v693_v38  ;;  %v75_v47 = vmul.f32 %v695_v39, %v695_v39 }
  0x9f   :  { %v703_v48 = vsub.f32 %v26_v12, %v60_v44  ;;  %v705_v49 = vsub.f32 %v27_v13, %v61_v45  ;;  %v86_v50 = vsel %vm30_vm0, %v74_v46, 0.0  ;;  %v89_v51 = vsel %vm30_vm0, %v75_v47, 0.0 }
  0xa0   :  { %102 = vadd.xlane.f32.xlu1 %v101_v43  ;;  %87 = vadd.xlane.f32.xlu0 %v86_v50 }
  0xa1   :  { %v76_v52 = vmul.f32 %v703_v48, %v703_v48  ;;  %v77_v53 = vmul.f32 %v705_v49, %v705_v49 }
  0xa3   :  { %v92_v54 = vsel %vm30_vm0, %v76_v52, 0.0  ;;  %v95_v55 = vsel %vm30_vm0, %v77_v53, 0.0 }
  0xa4   :  { %90 = vadd.xlane.f32.xlu1 %v89_v51  ;;  %93 = vadd.xlane.f32.xlu0 %v92_v54 }
  0xa8   :  { %96 = vadd.xlane.f32.xlu1 %v95_v55 }
 0x125   :  { %v82_v6 = vpop.xlane.xlu0 %81 }
 0x126   :  { %v104_v7 = vmul.f32 0.25, %v82_v6 }
 0x128   :  { %v112_v8 = vadd.f32 1e-05, %v104_v7 }
 0x129   :  { %v85_v9 = vpop.xlane.xlu1 %84  ;;  %v100_v10 = vpop.xlane.xlu0 %99 }
 0x12a   :  { %568 = vrsqrt.f32 %v112_v8  ;;  %v105_v11 = vmul.f32 0.25, %v85_v9  ;;  %v110_v12 = vmul.f32 0.25, %v100_v10  ;;  %v179_v8 = vsub.s32 1, %v715_v59 }
 0x12c   :  { %v113_v13 = vadd.f32 1e-05, %v105_v11  ;;  %v118_v14 = vadd.f32 1e-05, %v110_v12 }
 0x12d   :  { %v103_v15 = vpop.xlane.xlu1 %102  ;;  %v88_v16 = vpop.xlane.xlu0 %87 }
 0x12e   :  { %570 = vrsqrt.f32 %v113_v13  ;;  %v111_v17 = vmul.f32 0.25, %v103_v15  ;;  %v106_v18 = vmul.f32 0.25, %v88_v16 }
 0x12f   :  { %572 = vrsqrt.f32 %v118_v14 }
 0x130   :  { %v119_v19 = vadd.f32 1e-05, %v111_v17  ;;  %v114_v22 = vadd.f32 1e-05, %v106_v18 }
 0x131   :  { %v91_v23 = vpop.xlane.xlu1 %90  ;;  %v94_v24 = vpop.xlane.xlu0 %93 }
 0x132   :  { %574 = vrsqrt.f32 %v119_v19  ;;  %v107_v25 = vmul.f32 0.25, %v91_v23  ;;  %v108_v26 = vmul.f32 0.25, %v94_v24 }
 0x133   :  { %576 = vrsqrt.f32 %v114_v22  ;;  %v183_v22 = vsub.s32 2, %v715_v59 }
 0x134   :  { %v569_v27 = vpop.eup %568  ;;  %v115_v30 = vadd.f32 1e-05, %v107_v25  ;;  %v116_v31 = vadd.f32 1e-05, %v108_v26 }
 0x135   :  { %v128_v32 = vmul.f32 %v569_v27, %v675_v20  ;;  %v97_v33 = vpop.xlane.xlu1 %96  ;;  %v502_v20 = vld [vmem:[%s780_s2] ss:$0 sm:$0xff] }
 0x136   :  { %578 = vrsqrt.f32 %v115_v30  ;;  %v109_v34 = vmul.f32 0.25, %v97_v33 }
 0x137   :  { %580 = vrsqrt.f32 %v116_v31  ;;  %v143_v42 = vmul.f32 %v501_v35, %v128_v32 }
 0x138   :  { %v571_v36 = vpop.eup %570  ;;  %v117_v37 = vadd.f32 1e-05, %v109_v34 }
 0x139   :  { %v573_v40 = vpop.eup %572  ;;  %v129_v41 = vmul.f32 %v571_v36, %v683_v28  ;;  %v158_v50 = vadd.f32 %v502_v20, %v143_v42 }
 0x13a   :  { %v134_v43 = vmul.f32 %v573_v40, %v677_v21  ;;  %582 = vrsqrt.f32 %v117_v37 }
 0x13b   :  { %v144_v44 = vmul.f32 %v501_v35, %v129_v41 }
 0x13c   :  { %v575_v45 = vpop.eup %574  ;;  %v149_v52 = vmul.f32 %v501_v35, %v134_v43 }
 0x13d   :  { %v577_v46 = vpop.eup %576  ;;  %v135_v47 = vmul.f32 %v575_v45, %v685_v29  ;;  %v159_v51 = vadd.f32 %v502_v20, %v144_v44 }
 0x13e   :  { %v130_v53 = vmul.f32 %v577_v46, %v693_v38  ;;  %v164_v57 = vadd.f32 %v502_v20, %v149_v52 }
 0x13f   :  { %v166_v54 = vpack.c.bf16 %v159_v51, %v158_v50  ;;  %v150_v28 = vmul.f32 %v501_v35, %v135_v47 }
 0x140   :  { %v579_v55 = vpop.eup %578  ;;  %v145_v60 = vmul.f32 %v501_v35, %v130_v53 }
 0x141   :  { %v581_v56 = vpop.eup %580  ;;  %v131_v21 = vmul.f32 %v579_v55, %v695_v39  ;;  %504 = vmatmul.mubr.msk.bf16.vlgmr.msra.gmra.mrb[0].mxu0 %vm30_vm0, %v166_v54  ;;  %v165_v58 = vadd.f32 %v502_v20, %v150_v28 }
 0x142   :  { %v132_v61 = vmul.f32 %v581_v56, %v703_v48  ;;  %269 = vmatprep.mubr.bf16.mxu0 %v609_v2  ;;  %v160_v0 = vadd.f32 %v502_v20, %v145_v60 }
 0x143   :  { %v169_v29 = vpack.c.bf16 %v165_v58, %v164_v57  ;;  %v146_v62 = vmul.f32 %v501_v35, %v131_v21 }
 0x144   :  { %v583_v63 = vpop.eup %582  ;;  %v147_v3 = vmul.f32 %v501_v35, %v132_v61 }
 0x145   :  { %v133_v38 = vmul.f32 %v583_v63, %v705_v49  ;;  %507 = vmatmul.mubr.msk.bf16.vlgmr.msra.gmra.mrb[0].mxu1 %vm30_vm0, %v169_v29  ;;  %v161_v1 = vadd.f32 %v502_v20, %v146_v62  ;;  %v175_v49 = vsub.s32 0, %v715_v59 }
 0x146   :  { %550 = vmatpush3.bf16.msra.mxu1 %v723_v5  ;;  %551 = vmatprep.mubr.msk.bf16.mxu1 %vm30_vm0, %v166_v54  ;;  %v162_v48 = vadd.f32 %v502_v20, %v147_v3  ;;  %v171_v5 = vld [vmem:[%s782_s4] sm:$0x7]  ;;  %s610_s4 = smov [#allocation2]  }
 0x147   :  { %v167_v39 = vpack.c.bf16 %v161_v1, %v160_v0  ;;  %v148_v4 = vmul.f32 %v501_v35, %v133_v38  ;;  %v176_v9 = vrot.slane %v171_v5, %v175_v49  ;;  %v755_v10 = vrot.slane %v171_v5, %v179_v8  ;;  %s490_s13 = sshll.u32 %s610_s4, 4  ;;  %s491_s13 = int_to_ptr.vmem [resolvable:$true] %s490_s13 }
 0x148   :  { %v184_v35 = vrot.slane %v171_v5, %v183_v22  ;;  %s584_s14 = scalar_lea.vmem %s491_s13, 1536  ;;  %p589_p1 = scmp.lt.s32.totalorder %s491_s13, %s491_s13 }
 0x149   :  { %505 = vmatmul.mubr.msk.bf16.gmra.mrb[4].mxu0 %vm30_vm0, %v167_v39  ;;  %v163_v6 = vadd.f32 %v502_v20, %v148_v4  ;;  %p585_p0 = scmp.ne.s32.totalorder %s491_s13, %s584_s14  ;;  %p590_p2 = scmp.lt.s32.totalorder %s584_s14, %s584_s14 }
 0x14a   :  { %279 = vmatprep.mubr.bf16.mxu0 %v609_v2 }
 0x14b   :  { %v168_v7 = vpack.c.bf16 %v163_v6, %v162_v48  ;;  %p591_p3 = por %p590_p2, %p589_p1 }
 0x14d   :  { %552 = vmatmul.mubr.msk.bf16.vlgmr.msra.gmra.mrb[4].mxu1 %vm30_vm0, %v167_v39  ;;  %p592_p4 = pnand %p591_p3, %p585_p0 }
 0x14e   :  { %555 = vmatprep.mubr.msk.bf16.mxu1 %vm30_vm0, %v168_v7 }
 0x151   :  { %506 = vmatmul.mubr.msk.bf16.gmra.mrb[8].mxu0 %vm30_vm0, %v168_v7 }
 0x155   :  { %556 = vmatmul.mubr.msk.bf16.gmra.mrb[8].mxu1 %vm30_vm0, %v169_v29 }
 0x214   :  { %v261_v2 = vpop.f32.mrb[0].mxu0 }
 0x215   :  { %v262_v11 = vadd.f32 %v261_v2, %v176_v9  ;;  %v263_v12 = vpop.f32.mrb[1].mxu0 }
 0x216   :  { %v264_v13 = vadd.f32 %v263_v12, %v755_v10  ;;  %v265_v14 = vpop.f32.mrb[2].mxu0 }
 0x217   :  { %v266_v15 = vadd.f32 %v265_v14, %v176_v9  ;;  %v267_v16 = vpop.f32.mrb[3].mxu0 }
 0x218   :  { %v528_v17 = vpack.c.bf16 %v264_v13, %v262_v11  ;;  %v268_v18 = vadd.f32 %v267_v16, %v755_v10  ;;  %v291_v19 = vpop.f32.mrb[0].mxu1 }
 0x219   :  { %v292_v23 = vadd.f32 %v291_v19, %v176_v9  ;;  %v293_v24 = vpop.f32.mrb[1].mxu1 }
 0x21a   :  { %469 = vst [vmem:[#allocation2] sm:$0xff] %v528_v17  ;;  %v530_v25 = vpack.c.bf16 %v268_v18, %v266_v15  ;;  %v294_v26 = vadd.f32 %v293_v24, %v755_v10  ;;  %v295_v27 = vpop.f32.mrb[2].mxu1 }
 0x21b   :  { %v296_v30 = vadd.f32 %v295_v27, %v176_v9  ;;  %v297_v31 = vpop.f32.mrb[3].mxu1 }
 0x21c   :  { %471 = vst [vmem:[#allocation2 + $0xc] sm:$0xff] %v530_v25  ;;  %v540_v32 = vpack.c.bf16 %v294_v26, %v292_v23  ;;  %v298_v33 = vadd.f32 %v297_v31, %v755_v10  ;;  %v271_v34 = vpop.f32.mrb[4].mxu0 }
 0x21d   :  { %v272_v36 = vadd.f32 %v271_v34, %v176_v9  ;;  %v273_v37 = vpop.f32.mrb[5].mxu0 }
 0x21e   :  { %481 = vst [vmem:[#allocation2 + $0x48] sm:$0xff] %v540_v32  ;;  %v542_v40 = vpack.c.bf16 %v298_v33, %v296_v30  ;;  %v274_v59 = vadd.f32 %v273_v37, %v755_v10  ;;  %v275_v41 = vpop.f32.mrb[6].mxu0 }
 0x21f   :  { %v276_v42 = vadd.f32 %v275_v41, %v176_v9  ;;  %v277_v43 = vpop.f32.mrb[7].mxu0 }
 0x220   :  { %483 = vst [vmem:[#allocation2 + $0x54] sm:$0xff] %v542_v40  ;;  %v532_v20 = vpack.c.bf16 %v274_v59, %v272_v36  ;;  %v278_v44 = vadd.f32 %v277_v43, %v755_v10  ;;  %v553_v45 = vpop.f32.mrb[4].mxu1 }
 0x221   :  { %v343_v46 = vadd.f32 %v553_v45, %v184_v35  ;;  %v334_v47 = vpop.f32.mrb[5].mxu1 }
 0x222   :  { %473 = vst [vmem:[#allocation2 + $0x18] sm:$0xff] %v532_v20  ;;  %v534_v50 = vpack.c.bf16 %v278_v44, %v276_v42  ;;  %v335_v51 = vadd.f32 %v334_v47, %v184_v35  ;;  %v554_v52 = vpop.f32.mrb[6].mxu1 }
 0x223   :  { %v533_v53 = vpack.c.bf16 %v343_v46, %v343_v46  ;;  %v346_v54 = vadd.f32 %v554_v52, %v184_v35  ;;  %v337_v28 = vpop.f32.mrb[7].mxu1 }
 0x224   :  { %475 = vst [vmem:[#allocation2 + $0x24] sm:$0xff] %v534_v50  ;;  %v529_v55 = vpack.c.bf16 %v335_v51, %v335_v51  ;;  %v338_v56 = vadd.f32 %v337_v28, %v184_v35  ;;  %v281_v21 = vpop.f32.mrb[8].mxu0 }
 0x225   :  { %474 = vst [vmem:[#allocation2 + $0x20] sm:$0xf] %v533_v53  ;;  %v535_v57 = vpack.c.bf16 %v346_v54, %v346_v54  ;;  %v282_v58 = vadd.f32 %v281_v21, %v176_v9  ;;  %v283_v60 = vpop.f32.mrb[9].mxu0 }
 0x226   :  { %470 = vst [vmem:[#allocation2 + $0x8] sm:$0xf] %v529_v55  ;;  %v531_v61 = vpack.c.bf16 %v338_v56, %v338_v56  ;;  %v284_v29 = vadd.f32 %v283_v60, %v755_v10  ;;  %v285_v62 = vpop.f32.mrb[10].mxu0 }
 0x227   :  { %476 = vst [vmem:[#allocation2 + $0x2c] sm:$0xf] %v535_v57  ;;  %v286_v63 = vadd.f32 %v285_v62, %v176_v9  ;;  %v287_v38 = vpop.f32.mrb[11].mxu0 }
 0x228   :  { %472 = vst [vmem:[#allocation2 + $0x14] sm:$0xf] %v531_v61  ;;  %v536_v0 = vpack.c.bf16 %v284_v29, %v282_v58  ;;  %v288_v1 = vadd.f32 %v287_v38, %v755_v10  ;;  %v557_v3 = vpop.f32.mrb[8].mxu1 }
 0x229   :  { %v359_v39 = vadd.f32 %v557_v3, %v184_v35  ;;  %v350_v4 = vpop.f32.mrb[9].mxu1 }
 0x22a   :  { %477 = vst [vmem:[#allocation2 + $0x30] sm:$0xff] %v536_v0  ;;  %v538_v48 = vpack.c.bf16 %v288_v1, %v286_v63  ;;  %v351_v6 = vadd.f32 %v350_v4, %v184_v35  ;;  %v558_v7 = vpop.f32.mrb[10].mxu1 }
 0x22b   :  { %v541_v49 = vpack.c.bf16 %v359_v39, %v359_v39  ;;  %v362_v5 = vadd.f32 %v558_v7, %v184_v35  ;;  %v353_v8 = vpop.f32.mrb[11].mxu1 }
 0x22c   :  { %479 = vst [vmem:[#allocation2 + $0x3c] sm:$0xff] %v538_v48  ;;  %v537_v2 = vpack.c.bf16 %v351_v6, %v351_v6  ;;  %v354_v9 = vadd.f32 %v353_v8, %v184_v35 }
 0x22d   :  { %482 = vst [vmem:[#allocation2 + $0x50] sm:$0xf] %v541_v49  ;;  %v543_v11 = vpack.c.bf16 %v362_v5, %v362_v5 }
 0x22e   :  { %478 = vst [vmem:[#allocation2 + $0x38] sm:$0xf] %v537_v2  ;;  %v539_v12 = vpack.c.bf16 %v354_v9, %v354_v9 }
 0x22f   :  { %484 = vst [vmem:[#allocation2 + $0x5c] sm:$0xf] %v543_v11 }
 0x230   :  { %480 = vst [vmem:[#allocation2 + $0x44] sm:$0xf] %v539_v12 }
 0x231   :  { %595 = shalt.err (!%p592_p4)
}
 0x232   :  { %s596_s17 = scalar_lea.hbm %s783_s5, 1536 }
 0x233   :  { %p597_p5 = scmp.ne.s32.totalorder %s783_s5, %s596_s17  ;;  %p600_p6 = scmp.lt.u32.totalorder %s596_s17, %s783_s5 }
 0x235   :  { %p602_p7 = pnand %p600_p6, %p597_p5 }
 0x237   :  { %605 = shalt.err (!%p602_p7)
}
 0x238   :  { %s611_s22 = smov 192   ;;  %s612_s23 = smov 12  }
 0x239   :  { %496 = dma.vmem_to_hbm [thread:$0]  %s491_s13, 1536, %s783_s5, [#allocation3], %s611_s22, %s611_s22, %s612_s23  }
 0x23a   :  { %606 = dma.done.wait [#allocation3], 1536  }
 0x23b   :  { %607 = vsyncadd [#allocation3], 4294965760 }
 0x23c   :  { %500 = vsyncpa [#allocation3], 1 }

</bundles_post_ra>
